<compile_context>
chip_gen: v5e
topology: v5e:2x2
jax: 0.10.0
libtpu: 0.0.40
codegen_flags: <defaults>
</compile_context>

<pallas_src>
import functools

import numpy as np
import jax
import jax.numpy as jnp
from jax.experimental import pallas as pl
from jax.experimental.pallas import tpu as pltpu


# --------------------------------------------------------------------------
# Fused CRattention kernel: per batch element
#   pool over L -> packed FC (shuffles folded into Wct) -> chunk softmax ->
#   weighted sum of the d channel slices of x.
# --------------------------------------------------------------------------
def _crattention_kernel(x_ref, wct_ref, o_ref, *, channel, d):
    xb = x_ref[0]                                          # (C, L)
    # AdaptiveAvgPool1d(1): per-channel mean over length (lane reduction).
    y = jnp.mean(xb, axis=-1, keepdims=True)               # (C, 1)
    # Packed FC: wct[o*d+i, ch*d+i] = W_i[o, ch] absorbs both channel shuffles,
    # so u[o*d+i] == U_re[b, o*d+i] of the PyTorch forward.
    u = jnp.dot(wct_ref[...], y, preferred_element_type=jnp.float32)   # (C, 1)

    acc = jnp.zeros((channel, xb.shape[-1]), jnp.float32)
    for m in range(d):                                     # chunk softmax + fuse
        z = u[m * channel:(m + 1) * channel, :]            # (channel, 1)
        z = z - jnp.max(z, axis=0, keepdims=True)
        e = jnp.exp(z)
        w = e / jnp.sum(e, axis=0, keepdims=True)          # softmax over the chunk
        acc = acc + xb[m * channel:(m + 1) * channel, :].astype(jnp.float32) * w
    o_ref[0] = acc.astype(o_ref.dtype)


def crattention_forward(x, wct, *, channel, d):
    B, C, L = x.shape
    assert C == channel * d
    kernel = functools.partial(_crattention_kernel, channel=channel, d=d)
    return pl.pallas_call(
        kernel,
        out_shape=jax.ShapeDtypeStruct((B, channel, L), x.dtype),
        grid=(B,),
        in_specs=[
            pl.BlockSpec((1, C, L), lambda b: (b, 0, 0)),
            pl.BlockSpec((C, C), lambda b: (0, 0)),
        ],
        out_specs=pl.BlockSpec((1, channel, L), lambda b: (b, 0, 0)),
        compiler_params=pltpu.CompilerParams(
            dimension_semantics=("parallel",)),
    )(x, wct)


# --------------------------------------------------------------------------
# Host-side weight packing: fold the y1->y4 shuffle, the d block Linears and
# the attn->U_re shuffle into one (C, C) matrix so U_re = Wct @ mean_L(x).
#   Wct[o*d + i, ch*d + i] = fc_w[i][o, ch]
# --------------------------------------------------------------------------
def pack_fc_weights(fc_w, channel, d):
    C = channel * d
    wct = jnp.zeros((C, C), jnp.float32)
    for i in range(d):
        wct = wct.at[i::d, i::d].set(fc_w[i])
    return wct


# --------------------------------------------------------------------------
# Pure-JAX reference mirroring the PyTorch forward literally
# --------------------------------------------------------------------------
def reference(x, fc_w, *, channel, d):
    b, c, l = x.shape
    y1 = jnp.mean(x, axis=2)                                           # avg pool
    y4 = jnp.transpose(y1.reshape(b, channel, d), (0, 2, 1)).reshape(b, c)
    attn = [y4[:, channel * i:channel * (i + 1)] @ fc_w[i].T for i in range(d)]
    U = jnp.concatenate(attn, axis=1)
    U = jnp.transpose(U.reshape(b, d, channel), (0, 2, 1)).reshape(b, c)
    out = jnp.zeros((b, channel, l), x.dtype)
    for m in range(d):
        w = jax.nn.softmax(U[:, channel * m:channel * (m + 1)], axis=1)[:, :, None]
        out = out + x[:, channel * m:channel * (m + 1), :] * w
    return out


if __name__ == "__main__":
    # Small shapes consistent with the module: c = channel * d, length on lanes.
    B, channel, d, L = 2, 8, 3, 256
    C = channel * d

    key = jax.random.PRNGKey(0)
    kx, kw = jax.random.split(key)
    x = jax.random.normal(kx, (B, C, L), jnp.float32)
    wkeys = jax.random.split(kw, d)
    fc_w = [jax.random.normal(wkeys[i], (channel, channel), jnp.float32) * 0.1
            for i in range(d)]
    wct = pack_fc_weights(fc_w, channel, d)

    out = crattention_forward(x, wct, channel=channel, d=d)
    out = jax.block_until_ready(out)
    assert out.shape == (B, channel, L)

    ref = reference(x, fc_w, channel=channel, d=d)
    np.testing.assert_allclose(np.asarray(out), np.asarray(ref),
                               rtol=1e-4, atol=1e-4)
    print("KERNEL_OK")
</pallas_src>

<mosaic_0001>
module attributes {stable_mosaic.version = 11 : i64} {
  func.func @_crattention_kernel(%arg0: i32, %arg1: memref<1x24x256xf32, #tpu.memory_space<vmem>>, %arg2: memref<24x24xf32, #tpu.memory_space<vmem>>, %arg3: memref<1x8x256xf32, #tpu.memory_space<vmem>>) attributes {dimension_semantics = [#tpu.dimension_semantics<parallel>], iteration_bounds = array<i64: 2>, scalar_prefetch = 0 : i64, scratch_operands = 0 : i64, tpu.core_type = #tpu.core_type<tc>, window_params = [{transform_indices = @transform_0, window_bounds = array<i64: 1, 24, 256>}, {pipeline_mode = #tpu.pipeline_mode<synchronous>, transform_indices = @transform_1, window_bounds = array<i64: 24, 24>}, {transform_indices = @transform_2, window_bounds = array<i64: 1, 8, 256>}]} {
    %c0 = arith.constant 0 : index
    %c0_0 = arith.constant 0 : index
    %c0_1 = arith.constant 0 : index
    %0 = vector.load %arg1[%c0, %c0_0, %c0_1] : memref<1x24x256xf32, #tpu.memory_space<vmem>>, vector<1x24x256xf32>
    %1 = vector.shape_cast %0 : vector<1x24x256xf32> to vector<24x256xf32>
    %cst = arith.constant dense<0.000000e+00> : vector<24xf32>
    %2 = vector.multi_reduction <add>, %1, %cst [1] : vector<24x256xf32> to vector<24xf32>
    %3 = vector.shape_cast %2 : vector<24xf32> to vector<24x1xf32>
    %cst_2 = arith.constant 2.560000e+02 : f32
    %4 = vector.broadcast %cst_2 : f32 to vector<24x1xf32>
    %5 = arith.divf %3, %4 : vector<24x1xf32>
    %c0_3 = arith.constant 0 : index
    %c0_4 = arith.constant 0 : index
    %6 = vector.load %arg2[%c0_3, %c0_4] : memref<24x24xf32, #tpu.memory_space<vmem>>, vector<24x24xf32>
    %cst_5 = arith.constant dense<0.000000e+00> : vector<24x1xf32>
    %7 = tpu.matmul %6, %5, %cst_5 {dimension_numbers = #tpu.dot_dimension_numbers<[1], [0], [0], [1], [0, 0, 1, 1], [], []>} : vector<24x24xf32>, vector<24x1xf32>, vector<24x1xf32> -> vector<24x1xf32>
    %cst_6 = arith.constant 0.000000e+00 : f32
    %8 = vector.broadcast %cst_6 : f32 to vector<8x256xf32>
    %9 = vector.extract_strided_slice %7 {offsets = [0, 0], sizes = [8, 1], strides = [1, 1]} : vector<24x1xf32> to vector<8x1xf32>
    %cst_7 = arith.constant dense<0xFF800000> : vector<1xf32>
    %10 = vector.multi_reduction <maximumf>, %9, %cst_7 [0] : vector<8x1xf32> to vector<1xf32>
    %11 = vector.shape_cast %10 : vector<1xf32> to vector<1x1xf32>
    %12 = vector.broadcast %11 : vector<1x1xf32> to vector<8x1xf32>
    %13 = arith.subf %9, %12 : vector<8x1xf32>
    %14 = math.exp %13 : vector<8x1xf32>
    %cst_8 = arith.constant dense<0.000000e+00> : vector<1xf32>
    %15 = vector.multi_reduction <add>, %14, %cst_8 [0] : vector<8x1xf32> to vector<1xf32>
    %16 = vector.shape_cast %15 : vector<1xf32> to vector<1x1xf32>
    %17 = vector.broadcast %16 : vector<1x1xf32> to vector<8x1xf32>
    %18 = arith.divf %14, %17 : vector<8x1xf32>
    %19 = vector.extract_strided_slice %1 {offsets = [0, 0], sizes = [8, 256], strides = [1, 1]} : vector<24x256xf32> to vector<8x256xf32>
    %20 = vector.broadcast %18 : vector<8x1xf32> to vector<8x256xf32>
    %21 = arith.mulf %19, %20 : vector<8x256xf32>
    %22 = arith.addf %8, %21 : vector<8x256xf32>
    %23 = vector.extract_strided_slice %7 {offsets = [8, 0], sizes = [8, 1], strides = [1, 1]} : vector<24x1xf32> to vector<8x1xf32>
    %cst_9 = arith.constant dense<0xFF800000> : vector<1xf32>
    %24 = vector.multi_reduction <maximumf>, %23, %cst_9 [0] : vector<8x1xf32> to vector<1xf32>
    %25 = vector.shape_cast %24 : vector<1xf32> to vector<1x1xf32>
    %26 = vector.broadcast %25 : vector<1x1xf32> to vector<8x1xf32>
    %27 = arith.subf %23, %26 : vector<8x1xf32>
    %28 = math.exp %27 : vector<8x1xf32>
    %cst_10 = arith.constant dense<0.000000e+00> : vector<1xf32>
    %29 = vector.multi_reduction <add>, %28, %cst_10 [0] : vector<8x1xf32> to vector<1xf32>
    %30 = vector.shape_cast %29 : vector<1xf32> to vector<1x1xf32>
    %31 = vector.broadcast %30 : vector<1x1xf32> to vector<8x1xf32>
    %32 = arith.divf %28, %31 : vector<8x1xf32>
    %33 = vector.extract_strided_slice %1 {offsets = [8, 0], sizes = [8, 256], strides = [1, 1]} : vector<24x256xf32> to vector<8x256xf32>
    %34 = vector.broadcast %32 : vector<8x1xf32> to vector<8x256xf32>
    %35 = arith.mulf %33, %34 : vector<8x256xf32>
    %36 = arith.addf %22, %35 : vector<8x256xf32>
    %37 = vector.extract_strided_slice %7 {offsets = [16, 0], sizes = [8, 1], strides = [1, 1]} : vector<24x1xf32> to vector<8x1xf32>
    %cst_11 = arith.constant dense<0xFF800000> : vector<1xf32>
    %38 = vector.multi_reduction <maximumf>, %37, %cst_11 [0] : vector<8x1xf32> to vector<1xf32>
    %39 = vector.shape_cast %38 : vector<1xf32> to vector<1x1xf32>
    %40 = vector.broadcast %39 : vector<1x1xf32> to vector<8x1xf32>
    %41 = arith.subf %37, %40 : vector<8x1xf32>
    %42 = math.exp %41 : vector<8x1xf32>
    %cst_12 = arith.constant dense<0.000000e+00> : vector<1xf32>
    %43 = vector.multi_reduction <add>, %42, %cst_12 [0] : vector<8x1xf32> to vector<1xf32>
    %44 = vector.shape_cast %43 : vector<1xf32> to vector<1x1xf32>
    %45 = vector.broadcast %44 : vector<1x1xf32> to vector<8x1xf32>
    %46 = arith.divf %42, %45 : vector<8x1xf32>
    %47 = vector.extract_strided_slice %1 {offsets = [16, 0], sizes = [8, 256], strides = [1, 1]} : vector<24x256xf32> to vector<8x256xf32>
    %48 = vector.broadcast %46 : vector<8x1xf32> to vector<8x256xf32>
    %49 = arith.mulf %47, %48 : vector<8x256xf32>
    %50 = arith.addf %36, %49 : vector<8x256xf32>
    %c0_13 = arith.constant 0 : index
    %c0_14 = arith.constant 0 : index
    %c0_15 = arith.constant 0 : index
    %51 = vector.load %arg3[%c0_13, %c0_14, %c0_15] : memref<1x8x256xf32, #tpu.memory_space<vmem>>, vector<1x8x256xf32>
    %52 = vector.shape_cast %51 : vector<1x8x256xf32> to vector<8x256xf32>
    %53 = vector.shape_cast %50 : vector<8x256xf32> to vector<1x8x256xf32>
    tpu.vector_store %arg3[%c0_13, %c0_14, %c0_15], %53 {strides = array<i32>} : memref<1x8x256xf32, #tpu.memory_space<vmem>>, vector<1x8x256xf32>,
    return
  }
  func.func @transform_0(%arg0: i32) -> (i32, i32, i32) {
    %c0_i32 = arith.constant 0 : i32
    %c0_i32_0 = arith.constant 0 : i32
    %c0_i32_1 = arith.constant 0 : i32
    return %arg0, %c0_i32, %c0_i32_0 : i32, i32, i32
  }
  func.func @transform_1(%arg0: i32) -> (i32, i32) {
    %c0_i32 = arith.constant 0 : i32
    %c0_i32_0 = arith.constant 0 : i32
    %c0_i32_1 = arith.constant 0 : i32
    return %c0_i32, %c0_i32_0 : i32, i32
  }
  func.func @transform_2(%arg0: i32) -> (i32, i32, i32) {
    %c0_i32 = arith.constant 0 : i32
    %c0_i32_0 = arith.constant 0 : i32
    %c0_i32_1 = arith.constant 0 : i32
    return %arg0, %c0_i32, %c0_i32_0 : i32, i32, i32
  }
}

</mosaic_0001>

<bundles_post_ra>
// kernel: tpu_custom_call.1
= control target key start
LH: loop header
LB: loop body
LE: loop exit
PB: predicated region body
PF: predicated region fallthrough
CT: control target
= control target key end

     0   :  { %7 = vsyncpa [#allocation3], 0  ;;  %s901_s0 = inlined_call_operand.hbm [shape: f32[2,24,256], index: 0, kind: input, shape index: {}]   ;;  %s902_s1 = inlined_call_operand.hbm [shape: f32[24,24], index: 1, kind: input, shape index: {}]   ;;  %s903_s2 = inlined_call_operand.hbm [shape: f32[2,8,256], index: 2, kind: output, shape index: {}]  }
   0x1   :  { %9 = vsyncpa [#allocation3 + $0x1], 0 }
   0x2   :  { %10 = vsyncpa [#allocation6], 0 }
   0x3   :  { %11 = vsyncpa [#allocation4], 0 }
   0x4   :  { %13 = vsyncpa [#allocation4 + $0x1], 0  ;;  %s728_s9 = smov 0   ;;  %s730_s10 = smov 0  }
   0x5   :  { %s732_s11 = smov 0   ;;  %s734_s12 = smov 0  }
   0x6 LB: > { %s749_s13 = sadd.s32 4294967295, %s704_s12   ;;  %s468_s14 = sadd.s32 4294967294, %s704_s12   ;;  %s704_s12 = sphi %s734_s12, %s913_s12   ;;  %s700_s11 = sphi %s732_s11, %s912_s11   ;;  %s696_s10 = sphi %s730_s10, %s911_s10   ;;  %s692_s9 = sphi %s728_s9, %s910_s9  }
   0x7   : > { %p39_p0 = scmp.ne.s32.totalorder %s696_s10, %s692_s9  ;;  %p40_p1 = scmp.eq.s32.totalorder %s749_s13, 0 }
   0x8   : > { %p84_p2 = scmp.eq.s32.totalorder %s749_s13, 1  ;;  %p90_p3 = scmp.eq.s32.totalorder %s468_s14, 1 }
   0x9   : > { %p758_p4 = por %p40_p1, %p39_p0  ;;  %p469_p5 = scmp.ge.s32.totalorder %s704_s12, 1 }
   0xa   : > { %p763_p6 = por %p90_p3, %p39_p0  ;;  %p97_p7 = scmp.lt.s32.totalorder %s704_s12, 3 }
   0xb   : > { %s108_s19 = sshll.u32 %s902_s1, 4  ;;  %s706_s21 = smov [#allocation5]   ;;  %s109_s19 = int_to_ptr.hbm [resolvable:$true] %s108_s19 }
   0xc   : > { %p771_p8 = pnand %p469_p5, %p97_p7  ;;  %s110_s22 = sshll.u32 %s706_s21, 4  ;;  %s111_s22 = int_to_ptr.vmem [resolvable:$true] %s110_s22 }
   0xd   : > { %s781_s23 = sadd.s32 1, %s704_s12   ;;  %s707_s24 = smov 128  }
   0xe   : > { %p502_p9 = pneg %p771_p8  ;;  %s708_s25 = smov 8  }
   0xf   : > { %s23_s26 = ssub.s32 %s704_s12, %s781_s23  ;;  %s26_s27 = sadd.s32 1, %s700_s11 }
  0x10   : > { %p503_p10 = pnand %p502_p9, %p40_p1  ;;  %p24_p12 = scmp.eq.s32.totalorder %s23_s26, 0 }
  0x11   : > { %p33_p13 = scmp.ne.s32.totalorder %s700_s11, %s696_s10  ;;  %p34_p0 = scmp.eq.s32.totalorder %s704_s12, 0 }
  0x12   : > { %505 = dma.hbm_to_vmem [thread:$0]  (!%p503_p10), %s109_s19, 384, %s111_s22, [#allocation6], %s707_s24, %s707_s24, %s708_s25  }
  0x13   : > { %p515_p3 = scmp.lt.s32.totalorder %s704_s12, 2  ;;  %p35_p5 = por %p34_p0, %p33_p13 }
  0x14   : > { %s791_s28 = scalar_select %p24_p12, %s700_s11, %s26_s27  }
  0x15   : > { %p795_p7 = por %p84_p2, %p33_p13  ;;  %s124_s30 = sand.u32 1, %s700_s11  }
  0x16   : > { %s492_s3 = smul.u32 48, %s704_s12  ;;  %p804_p9 = pnand %p515_p3, %p35_p5 }
  0x17   : > { %s491_s4 = smul.u32 48, %s124_s30  ;;  %s125_s19 = scalar_lea.sflag [#allocation3], %s124_s30 }
  0x18   : > { %s133_s7 = scalar_lea.hbm %s901_s0, %s492_s3  ;;  %p608_p10 = pneg %p804_p9 }
  0x19   : > { %s134_s14 = sshll.u32 %s133_s7, 4  ;;  %s128_s17 = scalar_lea.vmem [#allocation2], %s491_s4  ;;  %s135_s14 = int_to_ptr.hbm [resolvable:$true] %s134_s14 }
  0x1a   : > { %s136_s18 = sshll.u32 %s128_s17, 4  ;;  %s604_s21 = sshra.s32 %s135_s14, 4  ;;  %s137_s18 = int_to_ptr.vmem [resolvable:$true] %s136_s18  ;;  %s605_s21 = int_to_ptr.hbm [resolvable:$true] %s604_s21 }
  0x1b   : > { %s606_s22 = scalar_lea.hbm %s605_s21, 48  ;;  %s611_s26 = scalar_lea.hbm %s901_s0, 96 }
  0x1c   : > { %p607_p2 = scmp.ne.s32.totalorder %s605_s21, %s606_s22  ;;  %p612_p0 = scmp.lt.s32.totalorder %s605_s21, %s901_s0 }
  0x1d   : > { %p613_p3 = scmp.lt.s32.totalorder %s611_s26, %s606_s22 }
  0x1e   : > { %p609_p12 = pnand %p608_p10, %p607_p2 }
  0x1f   : > { %p614_p5 = por %p613_p3, %p612_p0 }
  0x20   : > { %p610_p13 = pneg %p609_p12 }
  0x22   : > { %p615_p11 = pnand %p614_p5, %p610_p13 }
  0x24   : > { %618 = shalt.err (!%p615_p11)
}
  0x25   : > { %s709_s30 = smov 256   ;;  %s710_s4 = smov 16  }
  0x26   : > { %509 = dma.hbm_to_vmem [thread:$0]  (!%p804_p9), %s135_s14, 768, %s137_s18, %s125_s19, %s709_s30, %s709_s30, %s710_s4  }
  0x27   : > { %148 = sbr.rel (%p771_p8) target bundleno = 486 (0x1e6), region = 28  ;;  %s821_s5 = sand.u32 (!%p771_p8), 1, %s696_s10  }
  0x28   : > { %s493_s6 = smul.u32 (!%p771_p8), 48, %s821_s5  ;;  %s151_s7 = scalar_lea.sflag (!%p771_p8), [#allocation3], %s821_s5 }
  0x2a   : > { %s154_s17 = scalar_lea.vmem (!%p771_p8), [#allocation2], %s493_s6 }
  0x2c   : > { %679 = dma.done.wait (%p758_p4), %s151_s7, 768  }
  0x2d   : > { %681 = vsyncadd (%p758_p4), %s151_s7, 4294966528 }
  0x2e   : > { %683 = dma.done.wait (%p40_p1), [#allocation6], 384  }
  0x2f   : > { %685 = vsyncadd (%p40_p1), [#allocation6], 4294966912  ;;  %v833_v0 = vld [vmem:[%s154_s17 + $0x20] sm:$0xff]  ;;  %v835_v1 = vld [vmem:[%s154_s17 + $0x28] sm:$0xff]  ;;  %v711_v9 = vmov 256.0   ;;  %vm209_vm1 = vcmask 195584  }
  0x30   : > { %v193_v2 = vadd.f32 %v835_v1, %v833_v0  ;;  %v839_v3 = vld [vmem:[%s154_s17] sm:$0xff]  ;;  %v841_v4 = vld [vmem:[%s154_s17 + $0x8] sm:$0xff]  ;;  %v845_v6 = vld [vmem:[%s154_s17 + $0x10] sm:$0xff]  ;;  %560 = vrcp.f32 %v711_v9  ;;  %vm245_vm2 = vcmask 7168   ;;  %v712_v47 = vmov 0   ;;  %s475_s15 = sshll.u32 %s821_s5, 4 }
  0x31   : > { %v187_v5 = vadd.f32 %v841_v4, %v839_v3  ;;  %v847_v7 = vld [vmem:[%s154_s17 + $0x18] sm:$0xff]  ;;  %v206_v22 = vld [vmem:[#allocation5] sm:$0xff]  ;;  %v208_v24 = vld [vmem:[#allocation5 + $0x10] sm:$0xff]  ;;  %558 = vset.pattern.permute.xlu2 %v712_v47  ;;  %557 = vset.pattern.permute.xlu1 %v712_v47  ;;  %s484_s20 = sshll.u32 %s749_s13, 4  ;;  %s180_s13 = scalar_lea.vmem [#allocation7], %s475_s15 }
  0x32   : > { %194 = vadd.xlane.f32.xlu0 %v193_v2  ;;  %v190_v8 = vadd.f32 %v847_v7, %v845_v6  ;;  %v207_v23 = vld [vmem:[#allocation5 + $0x8] sm:$0xff]  ;;  %s383_s18 = scalar_lea.hbm %s903_s2, %s484_s20  ;;  %s385_s19 = sshll.u32 %s180_s13, 4  ;;  %s386_s19 = int_to_ptr.vmem [resolvable:$true] %s385_s19 }
  0x33   : > { %188 = vadd.xlane.f32.xlu1 %v187_v5  ;;  %559 = vset.pattern.permute.xlu0 %v712_v47  ;;  %s387_s21 = sshll.u32 %s383_s18, 4  ;;  %s372_s22 = scalar_lea.sflag [#allocation4], %s821_s5  ;;  %s388_s21 = int_to_ptr.hbm [resolvable:$true] %s387_s21 }
  0x34   : > { %s648_s24 = sshra.s32 %s388_s21, 4  ;;  %s654_s3 = scalar_lea.hbm %s903_s2, 32  ;;  %s649_s24 = int_to_ptr.hbm [resolvable:$true] %s648_s24 }
  0x35   : > { %s650_s25 = scalar_lea.hbm %s649_s24, 16  ;;  %p655_p11 = scmp.lt.s32.totalorder %s649_s24, %s903_s2 }
  0x36   : > { %v561_v10 = vpop.eup %560  ;;  %p651_p1 = scmp.ne.s32.totalorder %s649_s24, %s650_s25  ;;  %p656_p9 = scmp.lt.s32.totalorder %s654_s3, %s650_s25 }
  0x37   : > { %v197_v11 = vmul.f32 256.0, %v561_v10  ;;  %vm201_vm0 = vweird.f32 %v561_v10 }
  0x38   : > { %p652_p4 = pnand %p651_p1, %p795_p7  ;;  %p657_p2 = por %p656_p9, %p655_p11 }
  0x39   : > { %v198_v12 = vsub.f32 1.0, %v197_v11 }
  0x3a   : > { %191 = vadd.xlane.f32.xlu0 %v190_v8  ;;  %p653_p8 = pneg %p652_p4 }
  0x3b   : > { %v199_v13 = vmul.f32 %v561_v10, %v198_v12 }
  0x3c   : > { %p658_p10 = pnand %p657_p2, %p653_p8 }
  0x3d   : > { %v200_v14 = vadd.f32 %v561_v10, %v199_v13 }
  0x3f   : > { %v202_v15 = vsel %vm201_vm0, %v561_v10, %v200_v14 }
  0xa5   : > { %v195_v16 = vpop.xlane.xlu0 %194 }
  0xa6   : > { %v205_v17 = vmul.f32 %v202_v15, %v195_v16  ;;  %v189_v18 = vpop.xlane.xlu1 %188 }
  0xa7   : > { %v203_v21 = vmul.f32 %v202_v15, %v189_v18 }
  0xa8   : > { %232 = vmatpush.msra.mxu0 %v205_v17  ;;  %485 = vmatpush.msra.mxu1 %v205_v17 }
  0xa9   : > { %486 = vmatpush.msra.mxu2 %v205_v17 }
  0xad   : > { %v192_v19 = vpop.xlane.xlu0 %191 }
  0xae   : > { %v204_v20 = vmul.f32 %v202_v15, %v192_v19 }
  0xb0   : > { %233 = vmatpush.msra.mxu0 %v204_v20  ;;  %487 = vmatpush.msra.mxu1 %v204_v20 }
  0xb1   : > { %488 = vmatpush.msra.mxu2 %v204_v20 }
  0xb2   : > { %234 = vmatpush.msra.mxu0 %v203_v21  ;;  %489 = vmatpush.msra.mxu1 %v203_v21 }
  0xb3   : > { %490 = vmatpush.msra.mxu2 %v203_v21  ;;  %476 = vmatmul.msk.f32.vlgmr.msra.gmra.mxu0 %vm209_vm1, %v206_v22 }
  0xb4   : > { %477 = vmatmul.msk.f32.vlgmr.msra.gmra.mxu1 %vm209_vm1, %v207_v23  ;;  %478 = vmatmul.msk.f32.vlgmr.msra.gmra.mxu2 %vm209_vm1, %v208_v24 }
 0x130   : > { %v236_v25 = vpop.f32.mrf.mxu0 }
 0x131   : > { %v246_v26 = vsel %vm245_vm2, %v236_v25, -inf  ;;  %v239_v27 = vpop.f32.mrf.mxu1 }
 0x132   : > { %v247_v28 = vrot.slane %v246_v26, 4  ;;  %v287_v29 = vsel %vm245_vm2, %v239_v27, -inf }
 0x133   : > { %v288_v30 = vrot.slane %v287_v29, 4 }
 0x134   : > { %v248_v31 = vmax.f32 %v246_v26, %v247_v28 }
 0x135   : > { %v289_v32 = vmax.f32 %v287_v29, %v288_v30 }
 0x136   : > { %v249_v33 = vrot.slane %v248_v31, 2 }
 0x137   : > { %v290_v34 = vrot.slane %v289_v32, 2  ;;  %v242_v35 = vpop.f32.mrf.mxu2 }
 0x138   : > { %v250_v36 = vmax.f32 %v248_v31, %v249_v33  ;;  %v328_v37 = vsel %vm245_vm2, %v242_v35, -inf }
 0x139   : > { %v291_v38 = vmax.f32 %v289_v32, %v290_v34  ;;  %v329_v39 = vrot.slane %v328_v37, 4 }
 0x13a   : > { %v251_v40 = vrot.slane %v250_v36, 1 }
 0x13b   : > { %v292_v41 = vrot.slane %v291_v38, 1  ;;  %v330_v42 = vmax.f32 %v328_v37, %v329_v39 }
 0x13c   : > { %v252_v43 = vmax.f32 %v250_v36, %v251_v40 }
 0x13d   : > { %v293_v44 = vmax.f32 %v291_v38, %v292_v41  ;;  %v331_v45 = vrot.slane %v330_v42, 2 }
 0x13e   : > { %v253_v46 = vsub.f32 %v236_v25, %v252_v43 }
 0x13f   : > { %v294_v48 = vsub.f32 %v239_v27, %v293_v44  ;;  %v332_v49 = vmax.f32 %v330_v42, %v331_v45 }
 0x140   : > { %v254_v50 = vmul.f32 1.442695, %v253_v46 }
 0x141   : > { %v295_v51 = vmul.f32 1.442695, %v294_v48  ;;  %v333_v52 = vrot.slane %v332_v49, 1 }
 0x142   : > { %562 = vpow2.f32 %v254_v50 }
 0x143   : > { %564 = vpow2.f32 %v295_v51  ;;  %v334_v53 = vmax.f32 %v332_v49, %v333_v52 }
 0x145   : > { %v335_v54 = vsub.f32 %v242_v35, %v334_v53 }
 0x147   : > { %v336_v55 = vmul.f32 1.442695, %v335_v54 }
 0x148   : > { %v563_v56 = vpop.eup %562 }
 0x149   : > { %v565_v57 = vpop.eup %564  ;;  %v256_v58 = vsel %vm245_vm2, %v563_v56, 0.0  ;;  %566 = vpow2.f32 %v336_v55 }
 0x14a   : > { %v257_v59 = vrot.slane %v256_v58, 4  ;;  %v297_v60 = vsel %vm245_vm2, %v565_v57, 0.0 }
 0x14b   : > { %v298_v61 = vrot.slane %v297_v60, 4 }
 0x14c   : > { %v258_v62 = vadd.f32 %v257_v59, %v256_v58 }
 0x14d   : > { %v299_v63 = vadd.f32 %v298_v61, %v297_v60 }
 0x14e   : > { %v259_v2 = vrot.slane %v258_v62, 2 }
 0x14f   : > { %v856_v5 = vpop.eup %566  ;;  %v300_v8 = vrot.slane %v299_v63, 2 }
 0x150   : > { %v260_v9 = vadd.f32 %v259_v2, %v258_v62  ;;  %v338_v10 = vsel %vm245_vm2, %v856_v5, 0.0 }
 0x151   : > { %v301_v11 = vadd.f32 %v300_v8, %v299_v63  ;;  %v339_v12 = vrot.slane %v338_v10, 4 }
 0x152   : > { %v261_v13 = vrot.slane %v260_v9, 1 }
 0x153   : > { %v302_v14 = vrot.slane %v301_v11, 1  ;;  %v340_v15 = vadd.f32 %v339_v12, %v338_v10 }
 0x154   : > { %v262_v16 = vadd.f32 %v261_v13, %v260_v9 }
 0x155   : > { %v303_v17 = vadd.f32 %v302_v14, %v301_v11  ;;  %v341_v18 = vrot.slane %v340_v15, 2 }
 0x156   : > { %568 = vrcp.f32 %v262_v16  ;;  %v274_v28 = vand.u32 2147483648, %v262_v16  ;;  %v272_v31 = vand.u32 2147483647, %v262_v16  ;;  %vm268_vm5 = vweird.f32 %v262_v16 }
 0x157   : > { %570 = vrcp.f32 %v303_v17  ;;  %v342_v19 = vadd.f32 %v341_v18, %v340_v15  ;;  %v315_v29 = vand.u32 2147483648, %v303_v17  ;;  %v313_v33 = vand.u32 2147483647, %v303_v17 }
 0x158   : > { %vm309_vm6 = vweird.f32 %v303_v17  ;;  %v275_v37 = vor.u32 1.1754944e-38, %v274_v28  ;;  %vm273_vm9 = vcmp.eq.f32.partialorder %v272_v31, 8.507059e+37 }
 0x159   : > { %v343_v20 = vrot.slane %v342_v19, 1  ;;  %v316_v39 = vor.u32 1.1754944e-38, %v315_v29  ;;  %vm314_vm10 = vcmp.eq.f32.partialorder %v313_v33, 8.507059e+37 }
 0x15b   : > { %v344_v21 = vadd.f32 %v343_v20, %v342_v19 }
 0x15c   : > { %v569_v22 = vpop.eup %568 }
 0x15d   : > { %v571_v23 = vpop.eup %570  ;;  %572 = vrcp.f32 %v344_v21  ;;  %v264_v24 = vmul.f32 %v569_v22, %v262_v16  ;;  %vm269_vm3 = vweird.f32 %v569_v22  ;;  %v356_v46 = vand.u32 2147483648, %v344_v21 }
 0x15e   : > { %v305_v25 = vmul.f32 %v571_v23, %v303_v17  ;;  %vm310_vm4 = vweird.f32 %v571_v23  ;;  %vm270_vm7 = vmor %vm268_vm5, %vm269_vm3  ;;  %v354_v49 = vand.u32 2147483647, %v344_v21  ;;  %vm350_vm12 = vweird.f32 %v344_v21 }
 0x15f   : > { %v265_v26 = vsub.f32 1.0, %v264_v24  ;;  %vm311_vm8 = vmor %vm309_vm6, %vm310_vm4  ;;  %v357_v51 = vor.u32 1.1754944e-38, %v356_v46 }
 0x160   : > { %v306_v27 = vsub.f32 1.0, %v305_v25  ;;  %vm355_vm14 = vcmp.eq.f32.partialorder %v354_v49, 8.507059e+37 }
 0x161   : > { %v266_v30 = vmul.f32 %v569_v22, %v265_v26 }
 0x162   : > { %v307_v32 = vmul.f32 %v571_v23, %v306_v27 }
 0x163   : > { %v573_v34 = vpop.eup %572  ;;  %v267_v35 = vadd.f32 %v569_v22, %v266_v30 }
 0x164   : > { %v308_v36 = vadd.f32 %v571_v23, %v307_v32  ;;  %v346_v38 = vmul.f32 %v573_v34, %v344_v21  ;;  %vm351_vm11 = vweird.f32 %v573_v34 }
 0x165   : > { %v271_v40 = vsel %vm270_vm7, %v569_v22, %v267_v35  ;;  %vm352_vm13 = vmor %vm350_vm12, %vm351_vm11 }
 0x166   : > { %v312_v41 = vsel %vm311_vm8, %v571_v23, %v308_v36  ;;  %v276_v42 = vsel %vm273_vm9, %v275_v37, %v271_v40  ;;  %v347_v43 = vsub.f32 1.0, %v346_v38 }
 0x167   : > { %v317_v44 = vsel %vm314_vm10, %v316_v39, %v312_v41  ;;  %v277_v45 = vmul.f32 %v563_v56, %v276_v42 }
 0x168   : > { %v318_v47 = vmul.f32 %v565_v57, %v317_v44  ;;  %v348_v48 = vmul.f32 %v573_v34, %v347_v43 }
 0x169   : > { %280 = vperm.xlu1 %557, %v277_v45  }
 0x16a   : > { %321 = vperm.xlu2 %558, %v318_v47   ;;  %v349_v50 = vadd.f32 %v573_v34, %v348_v48 }
 0x16c   : > { %v353_v52 = vsel %vm352_vm13, %v573_v34, %v349_v50 }
 0x16d   : > { %v358_v53 = vsel %vm355_vm14, %v357_v51, %v353_v52 }
 0x16e   : > { %v359_v54 = vmul.f32 %v856_v5, %v358_v53 }
 0x172   : > { %362 = vperm.xlu2 %558, %v359_v54  }
 0x1c4   : > { %v322_v55 = vpop.permute.xlu2 %321 }
 0x1c5   : > { %v324_v58 = vmul.f32 %v322_v55, %v845_v6  ;;  %v325_v59 = vmul.f32 %v322_v55, %v847_v7 }
 0x1cc   : > { %v363_v56 = vpop.permute.xlu2 %362 }
 0x1cd   : > { %v365_v62 = vmul.f32 %v363_v56, %v833_v0  ;;  %v366_v63 = vmul.f32 %v363_v56, %v835_v1 }
 0x1db   : > { %v281_v57 = vpop.permute.xlu1 %280 }
 0x1dc   : > { %v283_v60 = vmul.f32 %v281_v57, %v839_v3  ;;  %v284_v61 = vmul.f32 %v281_v57, %v841_v4 }
 0x1de   : > { %v326_v2 = vadd.f32 %v324_v58, %v283_v60  ;;  %v327_v5 = vadd.f32 %v325_v59, %v284_v61 }
 0x1e0   : > { %v367_v8 = vadd.f32 %v365_v62, %v326_v2  ;;  %v368_v9 = vadd.f32 %v366_v63, %v327_v5 }
 0x1e2   : > { %369 = vst [vmem:[%s180_s13] sm:$0xff] %v367_v8 }
 0x1e3   : > { %370 = vst [vmem:[%s180_s13 + $0x8] sm:$0xff] %v368_v9 }
 0x1e4   : > { %661 = shalt.err (!%p658_p10)
}
 0x1e5   : > { %500 = dma.vmem_to_hbm [thread:$0]  (%p795_p7), %s386_s19, 256, %s388_s21, %s372_s22  }
 0x1e6 PF: > { %s399_s5 = sand.u32 1, %s692_s9   ;;  %p909_p12 = scmp.ge.s32.totalorder %s704_s12, 2 }
 0x1e7   : > { %s400_s6 = scalar_lea.sflag [#allocation4], %s399_s5 }
 0x1e8   : > { %p511_p13 = pnand %p909_p12, %p763_p6 }
 0x1ea   : > { %p512_p0 = pneg %p511_p13 }
 0x1ec   : > { %687 = dma.done.wait (%p512_p0), %s400_s6, 256  }
 0x1ed   : > { %689 = vsyncadd (%p512_p0), %s400_s6, 4294967040  ;;  %p16_p3 = scmp.ge.s32.totalorder %s781_s23, 4   ;;  %s910_s9 = smov %s696_s10 }
 0x1ee   : > { %s911_s10 = smov %s700_s11  ;;  %s912_s11 = smov %s791_s28 }
 0x1ef   : > { %s913_s12 = smov %s781_s23  ;;  %18 = sbr.rel (!%p16_p3) target bundleno = 6 (0x6), region = 77 }
 0x1f4   :  { %406 = vsyncpa [#allocation3], 1 }
 0x1f5   :  { %408 = vsyncpa [#allocation3 + $0x1], 1 }
 0x1f6   :  { %409 = vsyncpa [#allocation6], 1 }
 0x1f7   :  { %410 = vsyncpa [#allocation4], 1 }
 0x1f8   :  { %412 = vsyncpa [#allocation4 + $0x1], 1 }

</bundles_post_ra>
